<compile_context>
chip_gen: v5e
topology: v5e:2x2
jax: 0.10.0
libtpu: 0.0.40
codegen_flags: <defaults>
</compile_context>

<pallas_src>
import functools

import jax
import jax.numpy as jnp
import numpy as np
from jax import lax
from jax.experimental import pallas as pl
from jax.experimental.pallas import tpu as pltpu


def _sinkhorn_kernel(scores_ref, log_mu_ref, log_nu_ref, rmask_ref, cmask_ref,
                     norm_ref, alpha_ref, out_ref, s_ref, e_row_ref, e_col_ref,
                     *, num_iterations, inf, n_real_cols):
    """Fused padding + log-domain Sinkhorn for a block of Bt batches.

    Per grid step:
      scores_ref : (Bt, M, N)     raw scores
      log_mu_ref : (Bt, M1, 1)
      log_nu_ref : (Bt, 1, N1p)   lane-padded; -inf at masked / sentinel cols
      rmask_ref  : (Bt, M1, 1)    1.0 where row is invalid
      cmask_ref  : (Bt, 1, N1p)   1.0 where col is invalid (incl. lane padding)
      norm_ref   : (Bt, 1, 1)
      alpha_ref  : (1,) SMEM      learnable dustbin parameter
      out_ref    : (Bt, M1, N1p)
      s_ref / e_row_ref / e_col_ref : (Bt, M1, N1p) VMEM scratch
    """
    Bt, M, N = scores_ref.shape
    _, M1, N1p = s_ref.shape
    neg_inf = jnp.float32(-inf)
    alpha = alpha_ref[0]

    row_pad = rmask_ref[...]                       # (Bt, M1, 1)
    col_pad = cmask_ref[...]                       # (Bt, 1, N1p)

    # ---- fused glue: build the padded score tile in-place (single buffer) ---
    s_ref[...] = jnp.where((row_pad + col_pad) > 0.5, neg_inf, alpha)
    s_ref[:, :M, :N] = jnp.where(
        (row_pad[:, :M, :] + col_pad[:, :, :N]) > 0.5, neg_inf, scores_ref[...])

    # ---- hoist full-tile exps out of the loop (EUP was the bottleneck) ------
    row_max = jnp.max(s_ref[...], axis=2, keepdims=True)     # (Bt, M1, 1)
    col_max = jnp.max(s_ref[...], axis=1, keepdims=True)     # (Bt, 1, N1p)
    e_row_ref[...] = jnp.exp(s_ref[...] - row_max)            # exp done once
    e_col_ref[...] = jnp.exp(s_ref[...] - col_max)

    log_mu = log_mu_ref[...]                       # (Bt, M1, 1)
    log_nu = log_nu_ref[...]                       # (Bt, 1, N1p)

    # Lane-padding sentinel columns (j >= N1): keep them out of v.
    sentinel = lax.broadcasted_iota(jnp.int32, (1, 1, N1p), 2) >= n_real_cols
    tiny = jnp.float32(1e-30)   # floor: avoid log(0) if a whole row underflows

    def body(_, carry):
        u, v = carry
        # u = log_mu - logsumexp_j(s + v)
        max_v = jnp.max(v, axis=2, keepdims=True)                   # (Bt,1,1)
        w_v = jnp.exp(v - max_v)                                     # tiny exp
        srow = jnp.sum(e_row_ref[...] * w_v, axis=2, keepdims=True)  # (Bt,M1,1)
        u = log_mu - (row_max + max_v + jnp.log(jnp.maximum(srow, tiny)))
        # v = log_nu - logsumexp_i(s + u)
        max_u = jnp.max(u, axis=1, keepdims=True)                   # (Bt,1,1)
        w_u = jnp.exp(u - max_u)                                     # (Bt,M1,1)
        scol = jnp.sum(e_col_ref[...] * w_u, axis=1, keepdims=True)  # (Bt,1,N1p)
        v = log_nu - (col_max + max_u + jnp.log(jnp.maximum(scol, tiny)))
        v = jnp.where(sentinel, neg_inf, v)
        return u, v

    u0 = jnp.zeros_like(log_mu)
    v0 = jnp.where(sentinel, neg_inf, jnp.zeros_like(log_nu))
    # Strictly serial dependence through (u, v): no unroll.
    u, v = lax.fori_loop(0, num_iterations, body, (u0, v0))

    # outputs = padded_scores + u + v - norm
    out_ref[...] = s_ref[...] + u + v - norm_ref[...]


def learnable_log_optimal_transport(scores, alpha, *, num_iterations,
                                    row_masks=None, col_masks=None,
                                    inf=1.0e12, batch_block=None):
    """Forward pass matching LearnableLogOptimalTransport.forward.

    Args:
      scores: (B, M, N) float array.
      alpha:  learnable dustbin parameter, shape (1,) (init = ones(1)).
    Returns:
      (B, M+1, N+1) float32.
    """
    scores = jnp.asarray(scores, jnp.float32)
    B, M, N = scores.shape
    M1, N1 = M + 1, N + 1
    N1p = ((N1 + 127) // 128) * 128        # lane-dense last dim (unmasked vst)

    if row_masks is None:
        row_masks = jnp.ones((B, M), dtype=bool)
    if col_masks is None:
        col_masks = jnp.ones((B, N), dtype=bool)

    # ---- derive the batch block (Bt) from the chip's VMEM and tile size ----
    try:
        vmem_cap = int(pltpu.get_tpu_info().vmem_capacity_bytes)
    except Exception:
        vmem_cap = 64 * 1024 * 1024        # conservative default (v7x per-TC)
    vmem_limit = min(int(vmem_cap * 0.85), 120 * 1024 * 1024)
    tile_bytes = 4 * M1 * N1p
    # 2x scores-in (double-buffered) + 2x out (double-buffered) + 3 scratch.
    per_batch = 2 * 4 * M * N + 5 * tile_bytes
    per_batch = int(per_batch * 1.2) + (1 << 14)     # headroom for temporaries
    bt_cap = max(1, (vmem_limit * 17 // 20) // per_batch)
    # TODO(synk): for tiles that do not fit even at Bt=1 (M,N >~ 4k) also tile N.
    if batch_block is None:
        Bt = int(max(1, min(B, bt_cap, 64)))
    else:
        Bt = int(max(1, min(batch_block, B, bt_cap)))
    Bpad = ((B + Bt - 1) // Bt) * Bt

    def _pad_b(x, value):
        if Bpad == B:
            return x
        pad = [(0, Bpad - B)] + [(0, 0)] * (x.ndim - 1)
        return jnp.pad(x, pad, constant_values=value)

    scores_p = _pad_b(scores, 0.0)
    row_masks_p = _pad_b(row_masks, True)   # padded batches: fully valid
    col_masks_p = _pad_b(col_masks, True)

    # ---- tiny per-batch marginals (the big padded tile is built in-kernel) --
    prm = jnp.concatenate([~row_masks_p, jnp.zeros((Bpad, 1), bool)], axis=1)
    pcm = jnp.concatenate([~col_masks_p, jnp.zeros((Bpad, 1), bool)], axis=1)
    pcm_full = jnp.concatenate(
        [pcm, jnp.ones((Bpad, N1p - N1), bool)], axis=1)          # (Bpad, N1p)

    nvr = row_masks_p.astype(jnp.float32).sum(axis=1)
    nvc = col_masks_p.astype(jnp.float32).sum(axis=1)
    norm = -jnp.log(nvr + nvc)                                     # (Bpad,)

    log_mu = jnp.concatenate(
        [jnp.broadcast_to(norm[:, None], (Bpad, M)),
         (jnp.log(nvc) + norm)[:, None]], axis=1)
    log_mu = jnp.where(prm, -inf, log_mu)[:, :, None]              # (Bpad, M1, 1)

    log_nu = jnp.concatenate(
        [jnp.broadcast_to(norm[:, None], (Bpad, N)),
         (jnp.log(nvr) + norm)[:, None],
         jnp.zeros((Bpad, N1p - N1), jnp.float32)], axis=1)
    log_nu = jnp.where(pcm_full, -inf, log_nu)[:, None, :]         # (Bpad, 1, N1p)

    rmask_f = prm.astype(jnp.float32)[:, :, None]                  # (Bpad, M1, 1)
    cmask_f = pcm_full.astype(jnp.float32)[:, None, :]             # (Bpad, 1, N1p)
    norm3 = norm[:, None, None]                                    # (Bpad, 1, 1)
    alpha_arr = jnp.asarray(alpha, jnp.float32).reshape((1,))      # SMEM scalar

    kernel = functools.partial(_sinkhorn_kernel, num_iterations=num_iterations,
                               inf=inf, n_real_cols=N1)
    out = pl.pallas_call(
        kernel,
        out_shape=jax.ShapeDtypeStruct((Bpad, M1, N1p), jnp.float32),
        grid_spec=pltpu.PrefetchScalarGridSpec(
            num_scalar_prefetch=0,
            grid=(Bpad // Bt,),
            in_specs=[
                pl.BlockSpec((Bt, M, N), lambda b: (b, 0, 0)),     # raw scores
                pl.BlockSpec((Bt, M1, 1), lambda b: (b, 0, 0)),    # log_mu
                pl.BlockSpec((Bt, 1, N1p), lambda b: (b, 0, 0)),   # log_nu
                pl.BlockSpec((Bt, M1, 1), lambda b: (b, 0, 0)),    # row pad mask
                pl.BlockSpec((Bt, 1, N1p), lambda b: (b, 0, 0)),   # col pad mask
                pl.BlockSpec((Bt, 1, 1), lambda b: (b, 0, 0)),     # norm
                pl.BlockSpec(memory_space=pltpu.MemorySpace.SMEM), # alpha
            ],
            out_specs=pl.BlockSpec((Bt, M1, N1p), lambda b: (b, 0, 0)),
            scratch_shapes=[pltpu.VMEM((Bt, M1, N1p), jnp.float32)] * 3,
        ),
        compiler_params=pltpu.CompilerParams(
            # TODO(synk): on v7x (2 TensorCores/chip) use pltpu.CORE_PARALLEL to
            # shard the batch-block axis across TensorCores.
            dimension_semantics=("parallel",),
            vmem_limit_bytes=int(vmem_limit),
        ),
    )(scores_p, log_mu, log_nu, rmask_f, cmask_f, norm3, alpha_arr)

    return out[:B, :, :N1]


def _reference(scores, alpha, *, num_iterations, row_masks=None, col_masks=None,
               inf=1.0e12):
    """Pure-JAX reference replicating the PyTorch module (mask-aware)."""
    scores = jnp.asarray(scores, jnp.float32)
    B, M, N = scores.shape
    if row_masks is None:
        row_masks = jnp.ones((B, M), dtype=bool)
    if col_masks is None:
        col_masks = jnp.ones((B, N), dtype=bool)
    alpha = jnp.asarray(alpha, jnp.float32).reshape(())

    prm = jnp.concatenate([~row_masks, jnp.zeros((B, 1), bool)], axis=1)
    pcm = jnp.concatenate([~col_masks, jnp.zeros((B, 1), bool)], axis=1)
    psm = prm[:, :, None] | pcm[:, None, :]
    padded = jnp.concatenate(
        [jnp.concatenate([scores, jnp.broadcast_to(alpha, (B, M, 1))], axis=-1),
         jnp.broadcast_to(alpha, (B, 1, N + 1))], axis=1)
    padded = jnp.where(psm, -inf, padded)

    nvr = row_masks.astype(jnp.float32).sum(1)
    nvc = col_masks.astype(jnp.float32).sum(1)
    norm = -jnp.log(nvr + nvc)
    log_mu = jnp.concatenate(
        [jnp.broadcast_to(norm[:, None], (B, M)), (jnp.log(nvc) + norm)[:, None]], 1)
    log_mu = jnp.where(prm, -inf, log_mu)
    log_nu = jnp.concatenate(
        [jnp.broadcast_to(norm[:, None], (B, N)), (jnp.log(nvr) + norm)[:, None]], 1)
    log_nu = jnp.where(pcm, -inf, log_nu)

    u = jnp.zeros_like(log_mu)
    v = jnp.zeros_like(log_nu)
    for _ in range(num_iterations):
        u = log_mu - jax.nn.logsumexp(padded + v[:, None, :], axis=2)
        v = log_nu - jax.nn.logsumexp(padded + u[:, :, None], axis=1)
    return padded + u[:, :, None] + v[:, None, :] - norm[:, None, None]


if __name__ == "__main__":
    key = jax.random.PRNGKey(0)
    B, M, N = 2, 8, 12
    num_iterations = 100

    scores = jax.random.normal(key, (B, M, N), dtype=jnp.float32)
    # Parameter init: torch.nn.Parameter(torch.ones(1))
    alpha = jnp.ones((1,), dtype=jnp.float32)

    # Unmasked forward (module's default path).
    out = learnable_log_optimal_transport(
        scores, alpha, num_iterations=num_iterations)
    out = jax.block_until_ready(out)
    assert out.shape == (B, M + 1, N + 1)
    ref = _reference(scores, alpha, num_iterations=num_iterations)
    np.testing.assert_allclose(np.asarray(out), np.asarray(ref),
                               rtol=1e-4, atol=1e-3)

    # Masked forward (exercises the fused padding / -inf fill path).
    row_masks = jnp.stack([jnp.ones((M,), dtype=bool), jnp.arange(M) < M - 2])
    col_masks = jnp.stack([jnp.arange(N) < N - 3, jnp.ones((N,), dtype=bool)])
    out_m = learnable_log_optimal_transport(
        scores, alpha, num_iterations=num_iterations,
        row_masks=row_masks, col_masks=col_masks)
    out_m = jax.block_until_ready(out_m)
    ref_m = _reference(scores, alpha, num_iterations=num_iterations,
                       row_masks=row_masks, col_masks=col_masks)
    np.testing.assert_allclose(np.asarray(out_m), np.asarray(ref_m),
                               rtol=1e-4, atol=1e-3)

    print("KERNEL_OK")
</pallas_src>

<mosaic_0001>
module attributes {stable_mosaic.version = 11 : i64} {
  func.func @_sinkhorn_kernel(%arg0: i32, %arg1: memref<2x8x12xf32, #tpu.memory_space<vmem>>, %arg2: memref<2x9x1xf32, #tpu.memory_space<vmem>>, %arg3: memref<2x1x128xf32, #tpu.memory_space<vmem>>, %arg4: memref<2x9x1xf32, #tpu.memory_space<vmem>>, %arg5: memref<2x1x128xf32, #tpu.memory_space<vmem>>, %arg6: memref<2x1x1xf32, #tpu.memory_space<vmem>>, %arg7: memref<1xf32, #tpu.memory_space<smem>>, %arg8: memref<2x9x128xf32, #tpu.memory_space<vmem>>, %arg9: memref<2x9x128xf32, #tpu.memory_space<vmem>>, %arg10: memref<2x9x128xf32, #tpu.memory_space<vmem>>, %arg11: memref<2x9x128xf32, #tpu.memory_space<vmem>>) attributes {dimension_semantics = [#tpu.dimension_semantics<parallel>], iteration_bounds = array<i64: 1>, scalar_prefetch = 0 : i64, scratch_operands = 3 : i64, tpu.core_type = #tpu.core_type<tc>, window_params = [{transform_indices = @transform_0, window_bounds = array<i64: 2, 8, 12>}, {transform_indices = @transform_1, window_bounds = array<i64: 2, 9, 1>}, {transform_indices = @transform_2, window_bounds = array<i64: 2, 1, 128>}, {transform_indices = @transform_3, window_bounds = array<i64: 2, 9, 1>}, {transform_indices = @transform_4, window_bounds = array<i64: 2, 1, 128>}, {transform_indices = @transform_5, window_bounds = array<i64: 2, 1, 1>}, {transform_indices = @transform_6, window_bounds = array<i64: 1>}, {transform_indices = @transform_7, window_bounds = array<i64: 2, 9, 128>}]} {
    %c0 = arith.constant 0 : index
    %0 = memref.load %arg7[%c0] : memref<1xf32, #tpu.memory_space<smem>>
    %c0_0 = arith.constant 0 : index
    %c0_1 = arith.constant 0 : index
    %c0_2 = arith.constant 0 : index
    %1 = vector.load %arg4[%c0_0, %c0_1, %c0_2] : memref<2x9x1xf32, #tpu.memory_space<vmem>>, vector<2x9x1xf32>
    %c0_3 = arith.constant 0 : index
    %c0_4 = arith.constant 0 : index
    %c0_5 = arith.constant 0 : index
    %2 = vector.load %arg5[%c0_3, %c0_4, %c0_5] : memref<2x1x128xf32, #tpu.memory_space<vmem>>, vector<2x1x128xf32>
    %3 = vector.broadcast %1 : vector<2x9x1xf32> to vector<2x9x128xf32>
    %4 = vector.broadcast %2 : vector<2x1x128xf32> to vector<2x9x128xf32>
    %5 = arith.addf %3, %4 : vector<2x9x128xf32>
    %cst = arith.constant 5.000000e-01 : f32
    %6 = vector.broadcast %cst : f32 to vector<2x9x128xf32>
    %7 = arith.cmpf ogt, %5, %6 : vector<2x9x128xf32>
    %cst_6 = arith.constant -9.99999995E+11 : f32
    %8 = vector.broadcast %cst_6 : f32 to vector<2x9x128xf32>
    %9 = vector.broadcast %0 : f32 to vector<2x9x128xf32>
    %10 = arith.select %7, %8, %9 : vector<2x9x128xi1>, vector<2x9x128xf32>
    %c0_7 = arith.constant 0 : index
    %c0_8 = arith.constant 0 : index
    %c0_9 = arith.constant 0 : index
    %11 = vector.load %arg9[%c0_7, %c0_8, %c0_9] : memref<2x9x128xf32, #tpu.memory_space<vmem>>, vector<2x9x128xf32>
    tpu.vector_store %arg9[%c0_7, %c0_8, %c0_9], %10 {strides = array<i32>} : memref<2x9x128xf32, #tpu.memory_space<vmem>>, vector<2x9x128xf32>,
    %12 = vector.extract_strided_slice %1 {offsets = [0, 0, 0], sizes = [2, 8, 1], strides = [1, 1, 1]} : vector<2x9x1xf32> to vector<2x8x1xf32>
    %13 = vector.extract_strided_slice %2 {offsets = [0, 0, 0], sizes = [2, 1, 12], strides = [1, 1, 1]} : vector<2x1x128xf32> to vector<2x1x12xf32>
    %14 = vector.broadcast %12 : vector<2x8x1xf32> to vector<2x8x12xf32>
    %15 = vector.broadcast %13 : vector<2x1x12xf32> to vector<2x8x12xf32>
    %16 = arith.addf %14, %15 : vector<2x8x12xf32>
    %cst_10 = arith.constant 5.000000e-01 : f32
    %17 = vector.broadcast %cst_10 : f32 to vector<2x8x12xf32>
    %18 = arith.cmpf ogt, %16, %17 : vector<2x8x12xf32>
    %c0_11 = arith.constant 0 : index
    %c0_12 = arith.constant 0 : index
    %c0_13 = arith.constant 0 : index
    %19 = vector.load %arg1[%c0_11, %c0_12, %c0_13] : memref<2x8x12xf32, #tpu.memory_space<vmem>>, vector<2x8x12xf32>
    %cst_14 = arith.constant -9.99999995E+11 : f32
    %20 = vector.broadcast %cst_14 : f32 to vector<2x8x12xf32>
    %21 = arith.select %18, %20, %19 : vector<2x8x12xi1>, vector<2x8x12xf32>
    %c0_15 = arith.constant 0 : index
    %c0_16 = arith.constant 0 : index
    %c0_17 = arith.constant 0 : index
    %22 = vector.load %arg9[%c0_15, %c0_16, %c0_17] : memref<2x9x128xf32, #tpu.memory_space<vmem>>, vector<2x8x12xf32>
    tpu.vector_store %arg9[%c0_15, %c0_16, %c0_17], %21 {strides = array<i32>} : memref<2x9x128xf32, #tpu.memory_space<vmem>>, vector<2x8x12xf32>,
    %c0_18 = arith.constant 0 : index
    %c0_19 = arith.constant 0 : index
    %c0_20 = arith.constant 0 : index
    %23 = vector.load %arg9[%c0_18, %c0_19, %c0_20] : memref<2x9x128xf32, #tpu.memory_space<vmem>>, vector<2x9x128xf32>
    %cst_21 = arith.constant dense<0xFF800000> : vector<2x9xf32>
    %24 = vector.multi_reduction <maximumf>, %23, %cst_21 [2] : vector<2x9x128xf32> to vector<2x9xf32>
    %25 = vector.shape_cast %24 : vector<2x9xf32> to vector<2x9x1xf32>
    %c0_22 = arith.constant 0 : index
    %c0_23 = arith.constant 0 : index
    %c0_24 = arith.constant 0 : index
    %26 = vector.load %arg9[%c0_22, %c0_23, %c0_24] : memref<2x9x128xf32, #tpu.memory_space<vmem>>, vector<2x9x128xf32>
    %cst_25 = arith.constant dense<0xFF800000> : vector<2x128xf32>
    %27 = vector.multi_reduction <maximumf>, %26, %cst_25 [1] : vector<2x9x128xf32> to vector<2x128xf32>
    %28 = vector.shape_cast %27 : vector<2x128xf32> to vector<2x1x128xf32>
    %c0_26 = arith.constant 0 : index
    %c0_27 = arith.constant 0 : index
    %c0_28 = arith.constant 0 : index
    %29 = vector.load %arg9[%c0_26, %c0_27, %c0_28] : memref<2x9x128xf32, #tpu.memory_space<vmem>>, vector<2x9x128xf32>
    %30 = vector.broadcast %25 : vector<2x9x1xf32> to vector<2x9x128xf32>
    %31 = arith.subf %29, %30 : vector<2x9x128xf32>
    %32 = math.exp %31 : vector<2x9x128xf32>
    %c0_29 = arith.constant 0 : index
    %c0_30 = arith.constant 0 : index
    %c0_31 = arith.constant 0 : index
    %33 = vector.load %arg10[%c0_29, %c0_30, %c0_31] : memref<2x9x128xf32, #tpu.memory_space<vmem>>, vector<2x9x128xf32>
    tpu.vector_store %arg10[%c0_29, %c0_30, %c0_31], %32 {strides = array<i32>} : memref<2x9x128xf32, #tpu.memory_space<vmem>>, vector<2x9x128xf32>,
    %c0_32 = arith.constant 0 : index
    %c0_33 = arith.constant 0 : index
    %c0_34 = arith.constant 0 : index
    %34 = vector.load %arg9[%c0_32, %c0_33, %c0_34] : memref<2x9x128xf32, #tpu.memory_space<vmem>>, vector<2x9x128xf32>
    %35 = vector.broadcast %28 : vector<2x1x128xf32> to vector<2x9x128xf32>
    %36 = arith.subf %34, %35 : vector<2x9x128xf32>
    %37 = math.exp %36 : vector<2x9x128xf32>
    %c0_35 = arith.constant 0 : index
    %c0_36 = arith.constant 0 : index
    %c0_37 = arith.constant 0 : index
    %38 = vector.load %arg11[%c0_35, %c0_36, %c0_37] : memref<2x9x128xf32, #tpu.memory_space<vmem>>, vector<2x9x128xf32>
    tpu.vector_store %arg11[%c0_35, %c0_36, %c0_37], %37 {strides = array<i32>} : memref<2x9x128xf32, #tpu.memory_space<vmem>>, vector<2x9x128xf32>,
    %c0_38 = arith.constant 0 : index
    %c0_39 = arith.constant 0 : index
    %c0_40 = arith.constant 0 : index
    %39 = vector.load %arg2[%c0_38, %c0_39, %c0_40] : memref<2x9x1xf32, #tpu.memory_space<vmem>>, vector<2x9x1xf32>
    %c0_41 = arith.constant 0 : index
    %c0_42 = arith.constant 0 : index
    %c0_43 = arith.constant 0 : index
    %40 = vector.load %arg3[%c0_41, %c0_42, %c0_43] : memref<2x1x128xf32, #tpu.memory_space<vmem>>, vector<2x1x128xf32>
    %41 = tpu.iota {dimensions = array<i32: 2>} : vector<1x1x128xi32>
    %c13_i32 = arith.constant 13 : i32
    %42 = vector.broadcast %c13_i32 : i32 to vector<1x1x128xi32>
    %43 = arith.cmpi sge, %41, %42 : vector<1x1x128xi32>
    %cst_44 = arith.constant 0.000000e+00 : f32
    %44 = vector.broadcast %cst_44 : f32 to vector<2x9x1xf32>
    %cst_45 = arith.constant 0.000000e+00 : f32
    %45 = vector.broadcast %cst_45 : f32 to vector<2x1x128xf32>
    %cst_46 = arith.constant -9.99999995E+11 : f32
    %46 = vector.shape_cast %43 : vector<1x1x128xi1> to vector<1x1x128xi1>
    %47 = vector.broadcast %46 : vector<1x1x128xi1> to vector<2x1x128xi1>
    %48 = vector.broadcast %cst_46 : f32 to vector<2x1x128xf32>
    %49 = arith.select %47, %48, %45 : vector<2x1x128xi1>, vector<2x1x128xf32>
    %cst_47 = arith.constant 1.000000e-30 : f32
    %cst_48 = arith.constant -9.99999995E+11 : f32
    %c0_i32 = arith.constant 0 : i32
    %c100_i32 = arith.constant 100 : i32
    %50 = arith.addi %c0_i32, %c100_i32 : i32
    %c1_i32 = arith.constant 1 : i32
    %51:2 = scf.for %arg12 = %c0_i32 to %50 step %c1_i32 iter_args(%arg13 = %44, %arg14 = %49) -> (vector<2x9x1xf32>, vector<2x1x128xf32>)  : i32 {
      %cst_58 = arith.constant dense<0xFF800000> : vector<2x1xf32>
      %61 = vector.multi_reduction <maximumf>, %arg14, %cst_58 [2] : vector<2x1x128xf32> to vector<2x1xf32>
      %62 = vector.shape_cast %61 : vector<2x1xf32> to vector<2x1x1xf32>
      %63 = vector.broadcast %62 : vector<2x1x1xf32> to vector<2x1x128xf32>
      %64 = arith.subf %arg14, %63 : vector<2x1x128xf32>
      %65 = math.exp %64 : vector<2x1x128xf32>
      %c0_59 = arith.constant 0 : index
      %c0_60 = arith.constant 0 : index
      %c0_61 = arith.constant 0 : index
      %66 = vector.load %arg10[%c0_59, %c0_60, %c0_61] : memref<2x9x128xf32, #tpu.memory_space<vmem>>, vector<2x9x128xf32>
      %67 = vector.broadcast %65 : vector<2x1x128xf32> to vector<2x9x128xf32>
      %68 = arith.mulf %66, %67 : vector<2x9x128xf32>
      %cst_62 = arith.constant dense<0.000000e+00> : vector<2x9xf32>
      %69 = vector.multi_reduction <add>, %68, %cst_62 [2] : vector<2x9x128xf32> to vector<2x9xf32>
      %70 = vector.shape_cast %69 : vector<2x9xf32> to vector<2x9x1xf32>
      %71 = vector.broadcast %62 : vector<2x1x1xf32> to vector<2x9x1xf32>
      %72 = arith.addf %25, %71 : vector<2x9x1xf32>
      %73 = vector.broadcast %cst_47 : f32 to vector<2x9x1xf32>
      %74 = arith.maximumf %70, %73 : vector<2x9x1xf32>
      %75 = math.log %74 : vector<2x9x1xf32>
      %76 = arith.addf %72, %75 : vector<2x9x1xf32>
      %77 = arith.subf %39, %76 : vector<2x9x1xf32>
      %cst_63 = arith.constant dense<0xFF800000> : vector<2x1xf32>
      %78 = vector.multi_reduction <maximumf>, %77, %cst_63 [1] : vector<2x9x1xf32> to vector<2x1xf32>
      %79 = vector.shape_cast %78 : vector<2x1xf32> to vector<2x1x1xf32>
      %80 = vector.broadcast %79 : vector<2x1x1xf32> to vector<2x9x1xf32>
      %81 = arith.subf %77, %80 : vector<2x9x1xf32>
      %82 = math.exp %81 : vector<2x9x1xf32>
      %c0_64 = arith.constant 0 : index
      %c0_65 = arith.constant 0 : index
      %c0_66 = arith.constant 0 : index
      %83 = vector.load %arg11[%c0_64, %c0_65, %c0_66] : memref<2x9x128xf32, #tpu.memory_space<vmem>>, vector<2x9x128xf32>
      %84 = vector.broadcast %82 : vector<2x9x1xf32> to vector<2x9x128xf32>
      %85 = arith.mulf %83, %84 : vector<2x9x128xf32>
      %cst_67 = arith.constant dense<0.000000e+00> : vector<2x128xf32>
      %86 = vector.multi_reduction <add>, %85, %cst_67 [1] : vector<2x9x128xf32> to vector<2x128xf32>
      %87 = vector.shape_cast %86 : vector<2x128xf32> to vector<2x1x128xf32>
      %88 = vector.broadcast %79 : vector<2x1x1xf32> to vector<2x1x128xf32>
      %89 = arith.addf %28, %88 : vector<2x1x128xf32>
      %90 = vector.broadcast %cst_47 : f32 to vector<2x1x128xf32>
      %91 = arith.maximumf %87, %90 : vector<2x1x128xf32>
      %92 = math.log %91 : vector<2x1x128xf32>
      %93 = arith.addf %89, %92 : vector<2x1x128xf32>
      %94 = arith.subf %40, %93 : vector<2x1x128xf32>
      %95 = vector.shape_cast %43 : vector<1x1x128xi1> to vector<1x1x128xi1>
      %96 = vector.broadcast %95 : vector<1x1x128xi1> to vector<2x1x128xi1>
      %97 = vector.broadcast %cst_48 : f32 to vector<2x1x128xf32>
      %98 = arith.select %96, %97, %94 : vector<2x1x128xi1>, vector<2x1x128xf32>
      scf.yield %77, %98 : vector<2x9x1xf32>, vector<2x1x128xf32>
    }
    %c0_49 = arith.constant 0 : index
    %c0_50 = arith.constant 0 : index
    %c0_51 = arith.constant 0 : index
    %52 = vector.load %arg9[%c0_49, %c0_50, %c0_51] : memref<2x9x128xf32, #tpu.memory_space<vmem>>, vector<2x9x128xf32>
    %53 = vector.broadcast %51#0 : vector<2x9x1xf32> to vector<2x9x128xf32>
    %54 = arith.addf %52, %53 : vector<2x9x128xf32>
    %55 = vector.broadcast %51#1 : vector<2x1x128xf32> to vector<2x9x128xf32>
    %56 = arith.addf %54, %55 : vector<2x9x128xf32>
    %c0_52 = arith.constant 0 : index
    %c0_53 = arith.constant 0 : index
    %c0_54 = arith.constant 0 : index
    %57 = vector.load %arg6[%c0_52, %c0_53, %c0_54] : memref<2x1x1xf32, #tpu.memory_space<vmem>>, vector<2x1x1xf32>
    %58 = vector.broadcast %57 : vector<2x1x1xf32> to vector<2x9x128xf32>
    %59 = arith.subf %56, %58 : vector<2x9x128xf32>
    %c0_55 = arith.constant 0 : index
    %c0_56 = arith.constant 0 : index
    %c0_57 = arith.constant 0 : index
    %60 = vector.load %arg8[%c0_55, %c0_56, %c0_57] : memref<2x9x128xf32, #tpu.memory_space<vmem>>, vector<2x9x128xf32>
    tpu.vector_store %arg8[%c0_55, %c0_56, %c0_57], %59 {strides = array<i32>} : memref<2x9x128xf32, #tpu.memory_space<vmem>>, vector<2x9x128xf32>,
    return
  }
  func.func @transform_0(%arg0: i32) -> (i32, i32, i32) {
    %c0_i32 = arith.constant 0 : i32
    %c0_i32_0 = arith.constant 0 : i32
    %c0_i32_1 = arith.constant 0 : i32
    return %arg0, %c0_i32, %c0_i32_0 : i32, i32, i32
  }
  func.func @transform_1(%arg0: i32) -> (i32, i32, i32) {
    %c0_i32 = arith.constant 0 : i32
    %c0_i32_0 = arith.constant 0 : i32
    %c0_i32_1 = arith.constant 0 : i32
    return %arg0, %c0_i32, %c0_i32_0 : i32, i32, i32
  }
  func.func @transform_2(%arg0: i32) -> (i32, i32, i32) {
    %c0_i32 = arith.constant 0 : i32
    %c0_i32_0 = arith.constant 0 : i32
    %c0_i32_1 = arith.constant 0 : i32
    return %arg0, %c0_i32, %c0_i32_0 : i32, i32, i32
  }
  func.func @transform_3(%arg0: i32) -> (i32, i32, i32) {
    %c0_i32 = arith.constant 0 : i32
    %c0_i32_0 = arith.constant 0 : i32
    %c0_i32_1 = arith.constant 0 : i32
    return %arg0, %c0_i32, %c0_i32_0 : i32, i32, i32
  }
  func.func @transform_4(%arg0: i32) -> (i32, i32, i32) {
    %c0_i32 = arith.constant 0 : i32
    %c0_i32_0 = arith.constant 0 : i32
    %c0_i32_1 = arith.constant 0 : i32
    return %arg0, %c0_i32, %c0_i32_0 : i32, i32, i32
  }
  func.func @transform_5(%arg0: i32) -> (i32, i32, i32) {
    %c0_i32 = arith.constant 0 : i32
    %c0_i32_0 = arith.constant 0 : i32
    %c0_i32_1 = arith.constant 0 : i32
    return %arg0, %c0_i32, %c0_i32_0 : i32, i32, i32
  }
  func.func @transform_6(%arg0: i32) -> i32 {
    %c0_i32 = arith.constant 0 : i32
    %c0_i32_0 = arith.constant 0 : i32
    return %c0_i32 : i32
  }
  func.func @transform_7(%arg0: i32) -> (i32, i32, i32) {
    %c0_i32 = arith.constant 0 : i32
    %c0_i32_0 = arith.constant 0 : i32
    %c0_i32_1 = arith.constant 0 : i32
    return %arg0, %c0_i32, %c0_i32_0 : i32, i32, i32
  }
}

</mosaic_0001>

<bundles_post_ra>
// kernel: tpu_custom_call.1
= control target key start
LH: loop header
LB: loop body
LE: loop exit
PB: predicated region body
PF: predicated region fallthrough
CT: control target
= control target key end

     0   :  { %v517_v0 = vmov 0   ;;  %vm81_vm0 = vcmask 97280   ;;  %vm90_vm5 = vcmask 1040384   ;;  %v155_v58 = vlaneseq  ;;  %s751_s3 = inlined_call_operand.vmem [shape: f32[2,9,1], index: 3, kind: input, shape index: {}]   ;;  %s752_s4 = inlined_call_operand.vmem [shape: f32[2,1,128], index: 4, kind: input, shape index: {}]   ;;  %s753_s6 = inlined_call_operand.<no memory space> [shape: f32[1], index: 6, kind: input, shape index: {}]   ;;  %s754_s0 = inlined_call_operand.vmem [shape: f32[2,8,12], index: 0, kind: input, shape index: {}]   ;;  %s755_s5 = inlined_call_operand.vmem [shape: f32[2,1,1], index: 5, kind: input, shape index: {}]   ;;  %s756_s7 = inlined_call_operand.vmem [shape: f32[2,9,128], index: 7, kind: output, shape index: {}]   ;;  %s757_s1 = inlined_call_operand.vmem [shape: f32[2,9,1], index: 1, kind: input, shape index: {}]   ;;  %s758_s2 = inlined_call_operand.vmem [shape: f32[2,1,128], index: 2, kind: input, shape index: {}]  }
   0x1   :  { %442 = vset.pattern.permute.xlu1 %v517_v0  ;;  %441 = vset.pattern.permute.xlu0 %v517_v0  ;;  %v30_v1 = vld [vmem:[%s751_s3 + $0x10] sm:$0xff]  ;;  %v28_v2 = vld [vmem:[%s751_s3] sm:$0xff]  ;;  %v31_v3 = vld [vmem:[%s751_s3 + $0x18] sm:$0x1]  ;;  %v68_v9 = vstv %s753_s6 }
   0x2   :  { %46 = vperm.xlu1 %442, %v30_v1   ;;  %36 = vperm.xlu0 %441, %v28_v2   ;;  %v29_v4 = vld [vmem:[%s751_s3 + $0x8] sm:$0x1]  ;;  %v443_v5 = vld [vmem:[%s752_s4 + $0x1] ss:$0 sm:$0xff]  ;;  %v444_v6 = vld [vmem:[%s752_s4] ss:$0 sm:$0xff] }
   0x3   :  { %v78_v11 = vld [vmem:[%s754_s0 + $0x8] sm:$0xff]  ;;  %v77_v13 = vld [vmem:[%s754_s0] sm:$0xff]  ;;  %v615_v59 = vand.u32 127, %v155_v58  ;;  %v630_v62 = vld [vmem:[%s757_s1 + $0x10] sm:$0xff] }
   0x4   :  { %v620_v60 = vld [vmem:[%s757_s1] sm:$0xff]  ;;  %v625_v61 = vld [vmem:[%s757_s1 + $0x8] sm:$0x1]  ;;  %v636_v63 = vld [vmem:[%s757_s1 + $0x18] sm:$0x1]  ;;  %s670_s1 = smov 0  }
   0x5   :  { %vm157_vm6 = vcmp.ge.s32.totalorder %v615_v59, 13  ;;  %v641_v1 = vld [vmem:[%s758_s2] sm:$0x1]  ;;  %v646_v2 = vld [vmem:[%s758_s2 + $0x1] sm:$0x1] }
   0xa   :  { %51 = vperm.xlu1 %442, %v31_v3   ;;  %41 = vperm.xlu0 %441, %v29_v4   ;;  %v518_v3 = vmov 0.0  }
   0xb   :  { %v160_v4 = vsel %vm157_vm6, -1e+12, %v518_v3  }
  0x74   :  { %v47_v7 = vpop.permute.xlu1 %46  ;;  %v37_v8 = vpop.permute.xlu0 %36 }
  0x75   :  { %v62_v10 = vadd.f32 %v443_v5, %v47_v7  ;;  %v60_v12 = vadd.f32 %v444_v6, %v37_v8 }
  0x77   :  { %vm66_vm1 = vcmp.gt.f32.partialorder %v62_v10, 0.5  ;;  %vm64_vm2 = vcmp.gt.f32.partialorder %v60_v12, 0.5 }
  0x78   :  { %v71_v14 = vsel %vm66_vm1, -1e+12, %v68_v9  ;;  %v80_v15 = vsel %vm66_vm1, -1e+12, %v78_v11  ;;  %v69_v16 = vsel %vm64_vm2, -1e+12, %v68_v9 }
  0x79   :  { %75 = vst [vmem:[#allocation2 + $0x10] sm:$0xff] %v71_v14  ;;  %v79_v17 = vsel %vm64_vm2, -1e+12, %v77_v13 }
  0x7a   :  { %83 = vst.msk [vmem:[#allocation2 + $0x10] sm:$0xff] %vm81_vm0, %v80_v15 }
  0x7b   :  { %73 = vst [vmem:[#allocation2] sm:$0xff] %v69_v16 }
  0x7c   :  { %82 = vst.msk [vmem:[#allocation2] sm:$0xff] %vm81_vm0, %v79_v17  ;;  %v52_v18 = vpop.permute.xlu1 %51  ;;  %v42_v19 = vpop.permute.xlu0 %41 }
  0x7d   :  { %v63_v20 = vadd.f32 %v443_v5, %v52_v18  ;;  %v61_v21 = vadd.f32 %v444_v6, %v42_v19 }
  0x7f   :  { %vm67_vm3 = vcmp.gt.f32.partialorder %v63_v20, 0.5  ;;  %vm65_vm4 = vcmp.gt.f32.partialorder %v61_v21, 0.5  ;;  %v759_v21 = vmov %v160_v4 }
  0x80   :  { %v72_v22 = vsel %vm67_vm3, -1e+12, %v68_v9  ;;  %v70_v23 = vsel %vm65_vm4, -1e+12, %v68_v9 }
  0x81   :  { %76 = vst [vmem:[#allocation2 + $0x18] sm:$0x1] %v72_v22  ;;  %v589_v24 = vld [vmem:[#allocation2 + $0x10] sm:$0xff] }
  0x82   :  { %74 = vst [vmem:[#allocation2 + $0x8] sm:$0x1] %v70_v23  ;;  %94 = vmax.xlane.f32.xlu0 %v589_v24 }
  0x83   :  { %v592_v25 = vld [vmem:[#allocation2] sm:$0xff] }
  0x84   :  { %88 = vmax.xlane.f32.xlu2 %v592_v25 }
  0x88   :  { %v595_v26 = vld [vmem:[#allocation2 + $0x18] sm:$0x1] }
  0x89   :  { %v96_v27 = vsel %vm90_vm5, %v595_v26, -inf  ;;  %v599_v28 = vld [vmem:[#allocation2 + $0x8] sm:$0x1]  ;;  %v132_v43 = vld [vmem:[#allocation2 + $0x18] sm:$0x1] }
  0x8a   :  { %97 = vmax.xlane.f32.xlu1 %v96_v27  ;;  %v106_v29 = vmax.f32 %v589_v24, %v96_v27  ;;  %v91_v30 = vsel %vm90_vm5, %v599_v28, -inf  ;;  %v130_v47 = vld [vmem:[#allocation2 + $0x8] sm:$0x1] }
  0x8b   :  { %v99_v31 = vmax.f32 %v592_v25, %v91_v30 }
  0x8c   :  { %v107_v32 = vrot.slane %v106_v29, 4  ;;  %92 = vmax.xlane.f32.xlu2 %v91_v30 }
  0x8d   :  { %v100_v33 = vrot.slane %v99_v31, 4 }
  0x8e   :  { %v108_v34 = vmax.f32 %v106_v29, %v107_v32 }
  0x8f   :  { %v101_v35 = vmax.f32 %v99_v31, %v100_v33 }
  0x90   :  { %v109_v36 = vrot.slane %v108_v34, 2 }
  0x91   :  { %v102_v37 = vrot.slane %v101_v35, 2 }
  0x92   :  { %v110_v38 = vmax.f32 %v108_v34, %v109_v36 }
  0x93   :  { %v103_v39 = vmax.f32 %v101_v35, %v102_v37 }
  0x94   :  { %v111_v40 = vrot.slane %v110_v38, 1 }
  0x95   :  { %v104_v41 = vrot.slane %v103_v39, 1 }
  0x96   :  { %v605_v42 = vmax.f32 %v110_v38, %v111_v40 }
  0x97   :  { %v607_v44 = vmax.f32 %v103_v39, %v104_v41 }
  0x98   :  { %v135_v45 = vsub.f32 %v589_v24, %v605_v42  ;;  %v136_v46 = vsub.f32 %v132_v43, %v605_v42 }
  0x99   :  { %v133_v48 = vsub.f32 %v592_v25, %v607_v44  ;;  %v134_v49 = vsub.f32 %v130_v47, %v607_v44 }
  0x9a   :  { %v141_v50 = vmul.f32 1.442695, %v135_v45  ;;  %v143_v51 = vmul.f32 1.442695, %v136_v46 }
  0x9b   :  { %v137_v52 = vmul.f32 1.442695, %v133_v48  ;;  %v139_v53 = vmul.f32 1.442695, %v134_v49 }
  0x9c   :  { %445 = vpow2.f32 %v141_v50 }
  0x9d   :  { %447 = vpow2.f32 %v143_v51 }
  0x9e   :  { %449 = vpow2.f32 %v137_v52 }
  0x9f   :  { %451 = vpow2.f32 %v139_v53 }
  0xa2   :  { %v446_v54 = vpop.eup %445 }
  0xa3   :  { %v448_v55 = vpop.eup %447  ;;  %147 = vst [vmem:[#allocation4 + $0x8] sm:$0xff] %v446_v54 }
  0xa4   :  { %v450_v56 = vpop.eup %449  ;;  %148 = vst [vmem:[#allocation4 + $0x10] sm:$0x1] %v448_v55 }
  0xa5   :  { %v452_v57 = vpop.eup %451  ;;  %145 = vst [vmem:[#allocation4] sm:$0xff] %v450_v56 }
  0xa6   :  { %146 = vst [vmem:[#allocation4 + $0x18] sm:$0x1] %v452_v57 }
  0xf5   :  { %v650_v5 = vpop.xlane.xlu0 %94 }
  0xf6   :  { %v115_v6 = vsub.f32 %v589_v24, %v650_v5 }
  0xf7   :  { %v654_v7 = vpop.xlane.xlu2 %88 }
  0xf8   :  { %v121_v8 = vmul.f32 1.442695, %v115_v6  ;;  %v113_v9 = vsub.f32 %v592_v25, %v654_v7 }
  0xfa   :  { %453 = vpow2.f32 %v121_v8  ;;  %v117_v10 = vmul.f32 1.442695, %v113_v9 }
  0xfc   :  { %455 = vpow2.f32 %v117_v10 }
  0xfd   :  { %v658_v11 = vpop.xlane.xlu1 %97 }
  0xfe   :  { %v116_v12 = vsub.f32 %v595_v26, %v658_v11 }
  0xff   :  { %v662_v13 = vpop.xlane.xlu2 %92 }
 0x100   :  { %v454_v14 = vpop.eup %453  ;;  %v123_v15 = vmul.f32 1.442695, %v116_v12  ;;  %v114_v16 = vsub.f32 %v599_v28, %v662_v13 }
 0x101   :  { %127 = vst [vmem:[#allocation3 + $0x18] sm:$0xff] %v454_v14 }
 0x102   :  { %v456_v17 = vpop.eup %455  ;;  %457 = vpow2.f32 %v123_v15  ;;  %v119_v18 = vmul.f32 1.442695, %v114_v16 }
 0x103   :  { %125 = vst [vmem:[#allocation3 + $0x10] sm:$0xff] %v456_v17 }
 0x104   :  { %459 = vpow2.f32 %v119_v18 }
 0x108   :  { %v458_v19 = vpop.eup %457 }
 0x109   :  { %128 = vst [vmem:[#allocation3 + $0x8] sm:$0x1] %v458_v19 }
 0x10a   :  { %v460_v20 = vpop.eup %459 }
 0x10b   :  { %126 = vst [vmem:[#allocation3] sm:$0x1] %v460_v20 }
 0x10c LB: > { %v173_v22 = vsel %vm90_vm5, %v511_v4, -inf  ;;  %v176_v23 = vsel %vm90_vm5, %v507_v21, -inf  ;;  %v185_v31 = vld [vmem:[#allocation3 + $0x10] sm:$0xff]  ;;  %v187_v37 = vld [vmem:[#allocation3 + $0x18] sm:$0xff]  ;;  %v519_v10 = vmov 0   ;;  %vm231_vm7 = vcmask 7168   ;;  %s515_s1 = sphi %s670_s1, %s166_s1   ;;  %v511_v4 = vphi %v160_v4, %v761_v4   ;;  %v507_v21 = vphi %v759_v21, %v760_v21  }
 0x10d   : > { %174 = vmax.xlane.f32.xlu0 %v173_v22  ;;  %463 = vset.pattern.permute.xlu2 %v519_v10  ;;  %vm233_vm8 = vcmask 0   ;;  %s166_s1 = sadd.s32 1, %s515_s1  }
 0x10e   : > { %461 = vset.pattern.permute.xlu0 %v519_v10  ;;  %462 = vset.pattern.permute.xlu1 %v519_v10  ;;  %p163_p0 = scmp.ge.s32.totalorder %s166_s1, 100  }
 0x10f   :  { %v331_v59 = vld [vmem:[#allocation2] sm:$0xff] (%p163_p0) }
 0x110   : > { %v188_v41 = vld [vmem:[#allocation3 + $0x8] sm:$0x1] }
 0x112   : > { %v186_v34 = vld [vmem:[#allocation3] sm:$0x1] }
 0x115   : > { %177 = vmax.xlane.f32.xlu0 %v176_v23 }
 0x180   : > { %v175_v24 = vpop.xlane.xlu0 %174 }
 0x181   : > { %v179_v25 = vsub.f32 %v511_v4, %v175_v24  ;;  %v205_v53 = vperm.slane %v175_v24, 0 }
 0x183   : > { %v181_v26 = vmul.f32 1.442695, %v179_v25  ;;  %v207_v55 = vadd.f32 %v205_v53, %v654_v7  ;;  %v208_v6 = vadd.f32 %v205_v53, %v662_v13 }
 0x185   : > { %464 = vpow2.f32 %v181_v26 }
 0x188   : > { %v178_v27 = vpop.xlane.xlu0 %177 }
 0x189   : > { %v180_v28 = vsub.f32 %v507_v21, %v178_v27  ;;  %v206_v8 = vperm.slane %v178_v27, 0 }
 0x18b   : > { %v465_v29 = vpop.eup %464  ;;  %v183_v30 = vmul.f32 1.442695, %v180_v28  ;;  %v209_v16 = vadd.f32 %v206_v8, %v650_v5  ;;  %v210_v23 = vadd.f32 %v206_v8, %v658_v11 }
 0x18c   : > { %v189_v32 = vperm.slane %v465_v29, 0 }
 0x18d   : > { %466 = vpow2.f32 %v183_v30 }
 0x18e   : > { %v191_v33 = vmul.f32 %v189_v32, %v185_v31  ;;  %v192_v36 = vmul.f32 %v189_v32, %v186_v34 }
 0x190   : > { %195 = vadd.xlane.f32.xlu1 %v191_v33  ;;  %v197_v40 = vsel %vm90_vm5, %v192_v36, 0.0 }
 0x193   : > { %v467_v35 = vpop.eup %466 }
 0x194   : > { %v190_v38 = vperm.slane %v467_v35, 0 }
 0x196   : > { %v193_v39 = vmul.f32 %v190_v38, %v187_v37  ;;  %v194_v43 = vmul.f32 %v190_v38, %v188_v41 }
 0x198   : > { %198 = vadd.xlane.f32.xlu1 %v197_v40  ;;  %200 = vadd.xlane.f32.xlu2 %v193_v39  ;;  %v202_v45 = vsel %vm90_vm5, %v194_v43, 0.0 }
 0x1a0   : > { %203 = vadd.xlane.f32.xlu2 %v202_v45 }
 0x203   : > { %v196_v46 = vpop.xlane.xlu1 %195 }
 0x204   : > { %v211_v47 = vmax.f32 %v196_v46, 1e-30 }
 0x206   : > { %468 = vlog2.f32 %v211_v47 }
 0x20b   : > { %v199_v48 = vpop.xlane.xlu1 %198  ;;  %v201_v49 = vpop.xlane.xlu2 %200 }
 0x20c   : > { %v469_v50 = vpop.eup %468  ;;  %v212_v51 = vmax.f32 %v199_v48, 1e-30  ;;  %v213_v52 = vmax.f32 %v201_v49, 1e-30 }
 0x20d   : > { %v216_v54 = vmul.f32 0.6931472, %v469_v50 }
 0x20e   : > { %470 = vlog2.f32 %v212_v51 }
 0x20f   : > { %472 = vlog2.f32 %v213_v52  ;;  %v223_v56 = vadd.f32 %v216_v54, %v207_v55 }
 0x211   : > { %v684_v12 = vsub.f32 %v620_v60, %v223_v56 }
 0x213   : > { %v204_v57 = vpop.xlane.xlu2 %203  ;;  %v232_v18 = vsel %vm231_vm7, %v684_v12, -inf }
 0x214   : > { %v471_v58 = vpop.eup %470  ;;  %v214_v3 = vmax.f32 %v204_v57, 1e-30 }
 0x215   : > { %v473_v4 = vpop.eup %472  ;;  %v218_v9 = vmul.f32 0.6931472, %v471_v58  ;;  %v264_v58 = vld [vmem:[#allocation4 + $0x18] sm:$0x1] }
 0x216   : > { %474 = vlog2.f32 %v214_v3  ;;  %v220_v15 = vmul.f32 0.6931472, %v473_v4  ;;  %v263_v3 = vld [vmem:[#allocation4] sm:$0xff] }
 0x217   : > { %v224_v14 = vadd.f32 %v218_v9, %v208_v6 }
 0x218   : > { %v225_v20 = vadd.f32 %v220_v15, %v209_v16  ;;  %v266_v15 = vld [vmem:[#allocation4 + $0x10] sm:$0x1]  ;;  %v265_v16 = vld [vmem:[#allocation4 + $0x8] sm:$0xff] }
 0x219   : > { %v688_v17 = vsub.f32 %v625_v61, %v224_v14 }
 0x21a   : > { %v696_v26 = vsub.f32 %v630_v62, %v225_v20 }
 0x21b   : > { %v234_v19 = vsel %vm233_vm8, %v688_v17, -inf }
 0x21c   : > { %v475_v21 = vpop.eup %474  ;;  %v235_v22 = vmax.f32 %v232_v18, %v234_v19  ;;  %v242_v31 = vsel %vm231_vm7, %v696_v26, -inf }
 0x21d   : > { %v222_v24 = vmul.f32 0.6931472, %v475_v21 }
 0x21e   : > { %v236_v25 = vrot.slane %v235_v22, 4 }
 0x21f   : > { %v226_v27 = vadd.f32 %v222_v24, %v210_v23 }
 0x220   : > { %v237_v28 = vmax.f32 %v235_v22, %v236_v25 }
 0x221   : > { %v699_v29 = vsub.f32 %v636_v63, %v226_v27 }
 0x222   : > { %v238_v30 = vrot.slane %v237_v28, 2 }
 0x223   : > { %v243_v32 = vsel %vm233_vm8, %v699_v29, -inf }
 0x224   : > { %v239_v33 = vmax.f32 %v237_v28, %v238_v30  ;;  %v244_v34 = vmax.f32 %v242_v31, %v243_v32 }
 0x226   : > { %v240_v35 = vrot.slane %v239_v33, 1  ;;  %v245_v36 = vrot.slane %v244_v34, 4 }
 0x228   : > { %v241_v37 = vmax.f32 %v239_v33, %v240_v35  ;;  %v246_v38 = vmax.f32 %v244_v34, %v245_v36 }
 0x22a   : > { %v252_v39 = vsub.f32 %v688_v17, %v241_v37  ;;  %v247_v40 = vrot.slane %v246_v38, 2  ;;  %v251_v41 = vsub.f32 %v684_v12, %v241_v37 }
 0x22c   : > { %v257_v43 = vmul.f32 1.442695, %v252_v39  ;;  %v248_v45 = vmax.f32 %v246_v38, %v247_v40  ;;  %v255_v46 = vmul.f32 1.442695, %v251_v41 }
 0x22e   : > { %476 = vpow2.f32 %v257_v43  ;;  %v249_v47 = vrot.slane %v248_v45, 1 }
 0x22f   : > { %478 = vpow2.f32 %v255_v46 }
 0x230   : > { %v250_v48 = vmax.f32 %v248_v45, %v249_v47 }
 0x232   : > { %v254_v49 = vsub.f32 %v699_v29, %v250_v48  ;;  %v253_v50 = vsub.f32 %v696_v26, %v250_v48 }
 0x234   : > { %v477_v51 = vpop.eup %476  ;;  %v261_v52 = vmul.f32 1.442695, %v254_v49  ;;  %v259_v53 = vmul.f32 1.442695, %v253_v50 }
 0x235   : > { %v479_v54 = vpop.eup %478  ;;  %274 = vperm.xlu0 %461, %v477_v51  }
 0x236   : > { %480 = vpow2.f32 %v261_v52  ;;  %269 = vperm.xlu2 %463, %v479_v54  }
 0x237   : > { %482 = vpow2.f32 %v259_v53 }
 0x23c   : > { %v481_v55 = vpop.eup %480 }
 0x23d   : > { %v483_v56 = vpop.eup %482  ;;  %284 = vperm.xlu1 %462, %v481_v55   ;;  %488 = vset.pattern.permute.xlu0 (%p163_p0), %v517_v0  ;;  %v491_v55 = vld [vmem:[%s755_s5] ss:$0 sm:$0xff] (%p163_p0) }
 0x23e   : > { %279 = vperm.xlu2 %463, %v483_v56   ;;  %337 = vperm.xlu0 (%p163_p0), %488, %v684_v12   ;;  %v492_v56 = vld [vmem:[%s755_s5 + $0x1] ss:$0 sm:$0xff] (%p163_p0)  ;;  %v334_v12 = vld [vmem:[#allocation2 + $0x18] sm:$0x1] (%p163_p0) }
 0x245   : > { %309 = vperm.xlu1 %462, %v241_v37  }
 0x246   : > { %314 = vperm.xlu2 %463, %v250_v48   ;;  %342 = vperm.xlu0 (%p163_p0), %488, %v688_v17  }
 0x24d   :  { %489 = vset.pattern.permute.xlu1 (%p163_p0), %v517_v0 }
 0x24e   :  { %347 = vperm.xlu1 (%p163_p0), %489, %v696_v26   ;;  %490 = vset.pattern.permute.xlu2 (%p163_p0), %v517_v0  ;;  %v332_v26 = vld [vmem:[#allocation2 + $0x8] sm:$0x1] (%p163_p0) }
 0x24f   :  { %372 = vperm.xlu2 (%p163_p0), %490, %v491_v55  }
 0x256   :  { %352 = vperm.xlu1 (%p163_p0), %489, %v699_v29  }
 0x257   :  { %376 = vperm.xlu2 (%p163_p0), %490, %v492_v56  }
 0x290   : > { %v270_v57 = vpop.permute.xlu2 %269 }
 0x291   : > { %v287_v8 = vmul.f32 %v270_v57, %v263_v3 }
 0x298   : > { %v280_v18 = vpop.permute.xlu2 %279 }
 0x299   : > { %v289_v22 = vmul.f32 %v280_v18, %v265_v16 }
 0x2a0   : > { %v315_v47 = vpop.permute.xlu2 %314 }
 0x2a1   : > { %v318_v50 = vadd.f32 %v315_v47, %v605_v42 }
 0x2a7   : > { %v275_v4 = vpop.permute.xlu0 %274 }
 0x2a8   : > { %v288_v6 = vmul.f32 %v275_v4, %v264_v58 }
 0x2a9   :  { %v373_v42 = vpop.permute.xlu2 (%p163_p0), %372 }
 0x2aa   : > { %v291_v9 = vsel %vm90_vm5, %v288_v6, 0.0 }
 0x2ab   : > { %v292_v10 = vadd.f32 %v291_v9, %v287_v8 }
 0x2ad   : > { %v293_v14 = vrot.slane %v292_v10, 4 }
 0x2af   : > { %v294_v19 = vadd.f32 %v293_v14, %v292_v10  ;;  %v285_v20 = vpop.permute.xlu1 %284 }
 0x2b0   : > { %v290_v21 = vmul.f32 %v285_v20, %v266_v15  ;;  %v338_v63 = vpop.permute.xlu0 (%p163_p0), %337 }
 0x2b1   : > { %v295_v23 = vrot.slane %v294_v19, 2  ;;  %v377_v0 = vpop.permute.xlu2 (%p163_p0), %376 }
 0x2b2   : > { %v299_v24 = vsel %vm90_vm5, %v290_v21, 0.0 }
 0x2b3   : > { %v296_v25 = vadd.f32 %v295_v23, %v294_v19  ;;  %v300_v27 = vadd.f32 %v299_v24, %v289_v22 }
 0x2b5   : > { %v297_v28 = vrot.slane %v296_v25, 1  ;;  %v301_v30 = vrot.slane %v300_v27, 4 }
 0x2b7   : > { %v302_v31 = vadd.f32 %v301_v30, %v300_v27  ;;  %v298_v32 = vadd.f32 %v297_v28, %v296_v25  ;;  %v310_v38 = vpop.permute.xlu1 %309 }
 0x2b8   : > { %v317_v41 = vadd.f32 %v310_v38, %v607_v44  ;;  %v333_v44 = vld [vmem:[#allocation2 + $0x10] sm:$0xff] (%p163_p0)  ;;  %v343_v29 = vpop.permute.xlu0 (%p163_p0), %342 }
 0x2b9   : > { %v303_v33 = vrot.slane %v302_v31, 2  ;;  %v319_v34 = vmax.f32 %v298_v32, 1e-30  ;;  %v356_v58 = vadd.f32 (%p163_p0), %v343_v29, %v332_v26 }
 0x2bb   : > { %v304_v35 = vadd.f32 %v303_v33, %v302_v31  ;;  %484 = vlog2.f32 %v319_v34 }
 0x2bd   : > { %v305_v36 = vrot.slane %v304_v35, 1 }
 0x2bf   : > { %v306_v37 = vadd.f32 %v305_v36, %v304_v35 }
 0x2c0   :  { %v348_v62 = vpop.permute.xlu1 (%p163_p0), %347 }
 0x2c1   : > { %v485_v39 = vpop.eup %484  ;;  %v320_v40 = vmax.f32 %v306_v37, 1e-30 }
 0x2c2   : > { %v322_v43 = vmul.f32 0.6931472, %v485_v39 }
 0x2c3   : > { %486 = vlog2.f32 %v320_v40 }
 0x2c4   : > { %v325_v45 = vadd.f32 %v322_v43, %v317_v41 }
 0x2c6   : > { %v327_v46 = vsub.f32 %v641_v1, %v325_v45  ;;  %v357_v1 = vadd.f32 (%p163_p0), %v348_v62, %v333_v44 }
 0x2c8   : > { %v329_v48 = vsel %vm157_vm6, -1e+12, %v327_v46   ;;  %v353_v17 = vpop.permute.xlu1 (%p163_p0), %352 }
 0x2c9   : > { %v487_v49 = vpop.eup %486  ;;  %v761_v4 = vmov %v329_v48  ;;  %v359_v60 = vperm.slane (%p163_p0), %v329_v48, 0  ;;  %v358_v57 = vadd.f32 (%p163_p0), %v353_v17, %v334_v12 }
 0x2ca   : > { %v324_v51 = vmul.f32 0.6931472, %v487_v49 }
 0x2cb   :  { %v362_v4 = vadd.f32 (%p163_p0), %v359_v60, %v356_v58 }
 0x2cc   : > { %v326_v52 = vadd.f32 %v324_v51, %v318_v50 }
 0x2cd   :  { %165 = sbr.rel (!%p163_p0) target bundleno = 268 (0x10c), region = 55  ;;  %v380_v8 = vsub.f32 (%p163_p0), %v362_v4, %v373_v42 }
 0x2ce   : > { %v328_v53 = vsub.f32 %v646_v2, %v326_v52  ;;  %v355_v2 = vadd.f32 (%p163_p0), %v338_v63, %v331_v59 }
 0x2cf   :  { %384 = vst [vmem:[%s756_s7 + $0x8] sm:$0x1] (%p163_p0), %v380_v8 }
 0x2d0   : > { %v330_v54 = vsel %vm157_vm6, -1e+12, %v328_v53   ;;  %v361_v5 = vadd.f32 (%p163_p0), %v359_v60, %v355_v2 }
 0x2d1   : > { %v760_v21 = vmov %v330_v54  ;;  %v360_v61 = vperm.slane (%p163_p0), %v330_v54, 0 }
 0x2d2   :  { %v379_v11 = vsub.f32 %v361_v5, %v373_v42 }
 0x2d3   :  { %v363_v7 = vadd.f32 %v360_v61, %v357_v1  ;;  %v364_v3 = vadd.f32 %v360_v61, %v358_v57 }
 0x2d4   :  { %383 = vst [vmem:[%s756_s7] sm:$0xff] %v379_v11 }
 0x2d5   :  { %v381_v13 = vsub.f32 %v363_v7, %v377_v0  ;;  %v382_v6 = vsub.f32 %v364_v3, %v377_v0 }
 0x2d7   :  { %385 = vst [vmem:[%s756_s7 + $0x10] sm:$0xff] %v381_v13 }
 0x2d8   :  { %386 = vst [vmem:[%s756_s7 + $0x18] sm:$0x1] %v382_v6 }

</bundles_post_ra>
